<compile_context>
chip_gen: v7x
topology: tpu7x:2x2x1
jax: 0.10.0
libtpu: 0.0.40
codegen_flags: <defaults>
</compile_context>

<pallas_src>
import jax
import jax.numpy as jnp
from jax.experimental import pallas as pl
from jax.experimental.pallas import tpu as pltpu


def reward_kernel(a_ref, w1_ref, b1_ref, w2_ref, b2_ref, wp_ref, bp_ref, o_ref):
    # a_ref  : (A_pad, tb) f32   action features (zero-padded) x batch tile
    # w1_ref : (H, A_pad)  bf16  Linear(A, H).weight, zero-padded on the in-dim
    # b1_ref : (H, 1)      f32
    # w2_ref : (H, H)      bf16  Linear(H, H).weight
    # b2_ref : (H, 1)      f32
    # wp_ref : (H, 1)      f32   predict_layer.weight (1, H) stored as a column
    # bp_ref : (1, 1)      f32   SMEM scalar
    # o_ref  : (1, tb)     f32   lane-dense reward row
    a = a_ref[...].astype(jnp.bfloat16)

    # Layer 1 on the MXU: (H, A_pad) @ (A_pad, tb), K=8 padded contraction.
    h = jnp.tanh(
        jnp.dot(w1_ref[...], a, preferred_element_type=jnp.float32) + b1_ref[...]
    )  # (H, tb) f32

    # Layer 2 on the MXU: (H, H) @ (H, tb), bf16 operands, f32 accumulate.
    h = jnp.tanh(
        jnp.dot(w2_ref[...], h.astype(jnp.bfloat16),
                preferred_element_type=jnp.float32) + b2_ref[...]
    )  # (H, tb) f32

    # Predict layer (N=1) as VPU multiply + sublane (XLU) reduce; lane-dense row.
    o_ref[...] = jnp.sum(h * wp_ref[...], axis=0, keepdims=True) + bp_ref[0, 0]


def reward_model_forward(action, params, *, tile_b=None):
    """action: (B, A) float32 in [0, 1]. Returns (B, 1) float32."""
    w1, b1, w2, b2, wp, bp = params
    B, A = action.shape
    H = w1.shape[0]

    # Pad feature dim to a multiple of 8 (>=8) and batch to a multiple of 128 so
    # every tile is (8,128)-aligned with unmasked loads/stores.
    A_pad = max(8, ((A + 7) // 8) * 8)
    B_pad = ((B + 127) // 128) * 128

    if tile_b is None:
        # Single largest tile up to 4096 rows.  Per-step working set at 4096:
        # ~2 MiB per (128, tb) f32 activation temp (a few live) + tiny streams,
        # well under v7x's 32 MiB scoped default and trivial on v5e/v6e (128 MiB).
        cap = 4096
        if B_pad <= cap:
            tile_b = B_pad
        else:
            tile_b = next(t for t in range(cap, 127, -128) if B_pad % t == 0)
    assert B_pad % tile_b == 0 and tile_b % 128 == 0

    # One-time wrapper-side pad + transpose (layout plumbing, outside the kernel).
    a_pad = jnp.pad(action.astype(jnp.float32),
                    ((0, B_pad - B), (0, A_pad - A))).T          # (A_pad, B_pad) f32
    w1_pad = jnp.pad(w1, ((0, 0), (0, A_pad - A))).astype(jnp.bfloat16)  # (H, A_pad)
    w2_bf = w2.astype(jnp.bfloat16)                               # (H, H)

    grid = (B_pad // tile_b,)
    const = lambda i: (0, 0)  # constant block index: weights fetched once

    out_t = pl.pallas_call(
        reward_kernel,
        out_shape=jax.ShapeDtypeStruct((1, B_pad), jnp.float32),
        grid_spec=pltpu.PrefetchScalarGridSpec(
            num_scalar_prefetch=0,
            grid=grid,
            in_specs=[
                pl.BlockSpec((A_pad, tile_b), lambda i: (0, i)),     # action tile
                pl.BlockSpec((H, A_pad), const),                     # W1 (bf16)
                pl.BlockSpec((H, 1), const),                         # b1
                pl.BlockSpec((H, H), const),                         # W2 (bf16)
                pl.BlockSpec((H, 1), const),                         # b2
                pl.BlockSpec((H, 1), const),                         # Wp
                pl.BlockSpec(memory_space=pltpu.MemorySpace.SMEM),   # bp scalar
            ],
            out_specs=pl.BlockSpec((1, tile_b), lambda i: (0, i)),
        ),
        compiler_params=pltpu.CompilerParams(
            dimension_semantics=("parallel",)
        ),
    )(a_pad, w1_pad, b1, w2_bf, b2, wp, bp)

    return out_t[0, :B].reshape(B, 1)


def init_params(key, num_actions, hidden_dim):
    """Deterministic synthetic parameters (uniform, like nn.Linear defaults)."""
    ks = jax.random.split(key, 6)

    def unif(k, shape, fan_in):
        bound = 1.0 / jnp.sqrt(fan_in)
        return jax.random.uniform(k, shape, jnp.float32, -bound, bound)

    w1 = unif(ks[0], (hidden_dim, num_actions), num_actions)  # Linear(A, H).weight
    b1 = unif(ks[1], (hidden_dim, 1), num_actions)
    w2 = unif(ks[2], (hidden_dim, hidden_dim), hidden_dim)    # Linear(H, H).weight
    b2 = unif(ks[3], (hidden_dim, 1), hidden_dim)
    wp = unif(ks[4], (hidden_dim, 1), hidden_dim)             # Linear(H, 1).weight.T
    bp = unif(ks[5], (1, 1), hidden_dim)
    return (w1, b1, w2, b2, wp, bp)


def reward_model_ref(action, params):
    """Pure-JAX f32 reference of the PyTorch forward (nn.Linear semantics)."""
    w1, b1, w2, b2, wp, bp = params
    h = jnp.tanh(action @ w1.T + b1[:, 0])
    h = jnp.tanh(h @ w2.T + b2[:, 0])
    return h @ wp + bp[0, 0]


if __name__ == "__main__":
    # Small demo shape: 4 discrete actions (features in [0, 1]), hidden_dim=128
    # (module default), num_layers=2, batch=4 (padded to 128 inside the wrapper).
    B, A, H = 4, 4, 128

    key = jax.random.PRNGKey(0)
    k_param, k_act = jax.random.split(key)

    params = init_params(k_param, A, H)
    # action must satisfy 0 <= action <= 1 (as asserted in the PyTorch forward).
    action = jax.random.uniform(k_act, (B, A), jnp.float32, 0.0, 1.0)
    # state is unused by the PyTorch forward (only rank-checked); keep a dummy.
    state = jnp.zeros((B, A), jnp.float32)
    assert state.ndim == action.ndim
    assert bool(jnp.all(action >= 0)) and bool(jnp.all(action <= 1))

    out = reward_model_forward(action, params)
    out = jax.block_until_ready(out)

    ref = reward_model_ref(action, params)
    assert out.shape == (B, 1)
    # Loosened tolerance: bf16 MXU operands (f32 accumulate) are a deliberate
    # precision/performance tradeoff vs the f32 reference.
    assert jnp.allclose(out, ref, atol=2e-2, rtol=2e-2), "mismatch vs reference"

    print("KERNEL_OK")
</pallas_src>

<mosaic_0001>
module attributes {stable_mosaic.version = 11 : i64} {
  func.func @reward_kernel(%arg0: i32, %arg1: memref<8x128xf32, #tpu.memory_space<vmem>>, %arg2: memref<128x8xbf16, #tpu.memory_space<vmem>>, %arg3: memref<128x1xf32, #tpu.memory_space<vmem>>, %arg4: memref<128x128xbf16, #tpu.memory_space<vmem>>, %arg5: memref<128x1xf32, #tpu.memory_space<vmem>>, %arg6: memref<128x1xf32, #tpu.memory_space<vmem>>, %arg7: memref<1x1xf32, #tpu.memory_space<smem>>, %arg8: memref<1x128xf32, #tpu.memory_space<vmem>>) attributes {dimension_semantics = [#tpu.dimension_semantics<parallel>], iteration_bounds = array<i64: 1>, scalar_prefetch = 0 : i64, scratch_operands = 0 : i64, tpu.core_type = #tpu.core_type<tc>, window_params = [{transform_indices = @transform_0, window_bounds = array<i64: 8, 128>}, {pipeline_mode = #tpu.pipeline_mode<synchronous>, transform_indices = @transform_1, window_bounds = array<i64: 128, 8>}, {pipeline_mode = #tpu.pipeline_mode<synchronous>, transform_indices = @transform_2, window_bounds = array<i64: 128, 1>}, {pipeline_mode = #tpu.pipeline_mode<synchronous>, transform_indices = @transform_3, window_bounds = array<i64: 128, 128>}, {pipeline_mode = #tpu.pipeline_mode<synchronous>, transform_indices = @transform_4, window_bounds = array<i64: 128, 1>}, {pipeline_mode = #tpu.pipeline_mode<synchronous>, transform_indices = @transform_5, window_bounds = array<i64: 128, 1>}, {transform_indices = @transform_6, window_bounds = array<i64: 1, 1>}, {transform_indices = @transform_7, window_bounds = array<i64: 1, 128>}]} {
    %c0 = arith.constant 0 : index
    %c0_0 = arith.constant 0 : index
    %0 = vector.load %arg1[%c0, %c0_0] : memref<8x128xf32, #tpu.memory_space<vmem>>, vector<8x128xf32>
    %1 = arith.truncf %0 : vector<8x128xf32> to vector<8x128xbf16>
    %c0_1 = arith.constant 0 : index
    %c0_2 = arith.constant 0 : index
    %2 = vector.load %arg2[%c0_1, %c0_2] : memref<128x8xbf16, #tpu.memory_space<vmem>>, vector<128x8xbf16>
    %cst = arith.constant dense<0.000000e+00> : vector<128x128xf32>
    %3 = tpu.matmul %2, %1, %cst {dimension_numbers = #tpu.dot_dimension_numbers<[1], [0], [0], [1], [0, 0, 1, 1], [], []>} : vector<128x8xbf16>, vector<8x128xbf16>, vector<128x128xf32> -> vector<128x128xf32>
    %c0_3 = arith.constant 0 : index
    %c0_4 = arith.constant 0 : index
    %4 = vector.load %arg3[%c0_3, %c0_4] : memref<128x1xf32, #tpu.memory_space<vmem>>, vector<128x1xf32>
    %5 = vector.broadcast %4 : vector<128x1xf32> to vector<128x128xf32>
    %6 = arith.addf %3, %5 : vector<128x128xf32>
    %7 = math.tanh %6 : vector<128x128xf32>
    %c0_5 = arith.constant 0 : index
    %c0_6 = arith.constant 0 : index
    %8 = vector.load %arg4[%c0_5, %c0_6] : memref<128x128xbf16, #tpu.memory_space<vmem>>, vector<128x128xbf16>
    %9 = arith.truncf %7 : vector<128x128xf32> to vector<128x128xbf16>
    %cst_7 = arith.constant dense<0.000000e+00> : vector<128x128xf32>
    %10 = tpu.matmul %8, %9, %cst_7 {dimension_numbers = #tpu.dot_dimension_numbers<[1], [0], [0], [1], [0, 0, 1, 1], [], []>} : vector<128x128xbf16>, vector<128x128xbf16>, vector<128x128xf32> -> vector<128x128xf32>
    %c0_8 = arith.constant 0 : index
    %c0_9 = arith.constant 0 : index
    %11 = vector.load %arg5[%c0_8, %c0_9] : memref<128x1xf32, #tpu.memory_space<vmem>>, vector<128x1xf32>
    %12 = vector.broadcast %11 : vector<128x1xf32> to vector<128x128xf32>
    %13 = arith.addf %10, %12 : vector<128x128xf32>
    %14 = math.tanh %13 : vector<128x128xf32>
    %c0_10 = arith.constant 0 : index
    %c0_11 = arith.constant 0 : index
    %15 = vector.load %arg6[%c0_10, %c0_11] : memref<128x1xf32, #tpu.memory_space<vmem>>, vector<128x1xf32>
    %16 = vector.broadcast %15 : vector<128x1xf32> to vector<128x128xf32>
    %17 = arith.mulf %14, %16 : vector<128x128xf32>
    %cst_12 = arith.constant dense<0.000000e+00> : vector<128xf32>
    %18 = vector.multi_reduction <add>, %17, %cst_12 [0] : vector<128x128xf32> to vector<128xf32>
    %19 = vector.shape_cast %18 : vector<128xf32> to vector<1x128xf32>
    %c0_13 = arith.constant 0 : index
    %c0_14 = arith.constant 0 : index
    %20 = memref.load %arg7[%c0_13, %c0_14] : memref<1x1xf32, #tpu.memory_space<smem>>
    %21 = vector.broadcast %20 : f32 to vector<1x128xf32>
    %22 = arith.addf %19, %21 : vector<1x128xf32>
    %c0_15 = arith.constant 0 : index
    %c0_16 = arith.constant 0 : index
    %23 = vector.load %arg8[%c0_15, %c0_16] : memref<1x128xf32, #tpu.memory_space<vmem>>, vector<1x128xf32>
    tpu.vector_store %arg8[%c0_15, %c0_16], %22 {strides = array<i32>} : memref<1x128xf32, #tpu.memory_space<vmem>>, vector<1x128xf32>,
    return
  }
  func.func @transform_0(%arg0: i32) -> (i32, i32) {
    %c0_i32 = arith.constant 0 : i32
    %c0_i32_0 = arith.constant 0 : i32
    return %c0_i32, %arg0 : i32, i32
  }
  func.func @transform_1(%arg0: i32) -> (i32, i32) {
    %c0_i32 = arith.constant 0 : i32
    %c0_i32_0 = arith.constant 0 : i32
    %c0_i32_1 = arith.constant 0 : i32
    return %c0_i32, %c0_i32_0 : i32, i32
  }
  func.func @transform_2(%arg0: i32) -> (i32, i32) {
    %c0_i32 = arith.constant 0 : i32
    %c0_i32_0 = arith.constant 0 : i32
    %c0_i32_1 = arith.constant 0 : i32
    return %c0_i32, %c0_i32_0 : i32, i32
  }
  func.func @transform_3(%arg0: i32) -> (i32, i32) {
    %c0_i32 = arith.constant 0 : i32
    %c0_i32_0 = arith.constant 0 : i32
    %c0_i32_1 = arith.constant 0 : i32
    return %c0_i32, %c0_i32_0 : i32, i32
  }
  func.func @transform_4(%arg0: i32) -> (i32, i32) {
    %c0_i32 = arith.constant 0 : i32
    %c0_i32_0 = arith.constant 0 : i32
    %c0_i32_1 = arith.constant 0 : i32
    return %c0_i32, %c0_i32_0 : i32, i32
  }
  func.func @transform_5(%arg0: i32) -> (i32, i32) {
    %c0_i32 = arith.constant 0 : i32
    %c0_i32_0 = arith.constant 0 : i32
    %c0_i32_1 = arith.constant 0 : i32
    return %c0_i32, %c0_i32_0 : i32, i32
  }
  func.func @transform_6(%arg0: i32) -> (i32, i32) {
    %c0_i32 = arith.constant 0 : i32
    %c0_i32_0 = arith.constant 0 : i32
    %c0_i32_1 = arith.constant 0 : i32
    return %c0_i32, %c0_i32_0 : i32, i32
  }
  func.func @transform_7(%arg0: i32) -> (i32, i32) {
    %c0_i32 = arith.constant 0 : i32
    %c0_i32_0 = arith.constant 0 : i32
    return %c0_i32, %arg0 : i32, i32
  }
}

</mosaic_0001>

<bundles_post_ra>
// kernel: tpu_custom_call.1
= control target key start
LH: loop header
LB: loop body
LE: loop exit
PB: predicated region body
PF: predicated region fallthrough
CT: control target
= control target key end

     0   :  { %vm208_vm0 = vcmask 1043456   ;;  %v981_v3 = vmov 0   ;;  %vm183_vm1 = vcmask 64512   ;;  %s1241_s0 = inlined_call_operand.vmem [shape: f32[8,128], index: 0, kind: input, shape index: {}]   ;;  %s1242_s1 = inlined_call_operand.vmem [shape: bf16[128,8], index: 1, kind: input, shape index: {}]   ;;  %s1243_s2 = inlined_call_operand.vmem [shape: f32[128,1], index: 2, kind: input, shape index: {}]   ;;  %s1244_s3 = inlined_call_operand.vmem [shape: bf16[128,128], index: 3, kind: input, shape index: {}]   ;;  %s1245_s4 = inlined_call_operand.vmem [shape: f32[128,1], index: 4, kind: input, shape index: {}]   ;;  %s1246_s5 = inlined_call_operand.vmem [shape: f32[128,1], index: 5, kind: input, shape index: {}]   ;;  %s1247_s6 = inlined_call_operand.<no memory space> [shape: f32[1,1], index: 6, kind: input, shape index: {}]   ;;  %s1248_s7 = inlined_call_operand.hbm [shape: f32[1,128], index: 7, kind: output, shape index: {}]  }
   0x1   :  { %v49_v0 = vld [vmem:[%s1243_s2 + $0x10] sm:$0xff]  ;;  %v47_v1 = vld [vmem:[%s1243_s2] sm:$0xff]  ;;  %876 = vset.pattern.permute.xlu1 %v981_v3  ;;  %875 = vset.pattern.permute.xlu0 %v981_v3  ;;  %v50_v5 = vld [vmem:[%s1243_s2 + $0x18] sm:$0xff] }
   0x2   :  { %v29_v2 = vld [vmem:[%s1241_s0] sm:$0xff]  ;;  %75 = vperm.xlu1 %876, %v49_v0   ;;  %65 = vperm.xlu0 %875, %v47_v1   ;;  %v48_v8 = vld [vmem:[%s1243_s2 + $0x8] sm:$0xff]  ;;  %v879_v10 = vld [vmem:[%s1242_s1 + $0x10] sm:$0xff]  }
   0x3   :  { %v30_v4 = vpack.c.bf16 %v29_v2, %v29_v2  ;;  %v877_v6 = vld [vmem:[%s1242_s1] sm:$0xff]   ;;  %v878_v9 = vld [vmem:[%s1242_s1 + $0x8] sm:$0xff]   ;;  %v54_v13 = vld [vmem:[%s1243_s2 + $0x38] sm:$0xff] }
   0x4   :  { %808 = vmatprep.mubr.msk.bf16.mxu0 %vm183_vm1, %v877_v6  ;;  %v52_v11 = vld [vmem:[%s1243_s2 + $0x28] sm:$0xff]  ;;  %v51_v12 = vld [vmem:[%s1243_s2 + $0x20] sm:$0xff]  ;;  %v53_v14 = vld [vmem:[%s1243_s2 + $0x30] sm:$0xff] }
   0x5   :  { %872 = vmatprep.subr.msk.bf16.mxu0 %vm208_vm0, %v30_v4  ;;  %v210_v7 = vsel %vm208_vm0, %v30_v4, 0  ;;  %v880_v15 = vld [vmem:[%s1242_s1 + $0x18] sm:$0xff]   ;;  %v881_v16 = vld [vmem:[%s1242_s1 + $0x20] sm:$0xff]   ;;  %v56_v17 = vld [vmem:[%s1243_s2 + $0x48] sm:$0xff] }
   0x6   :  { %807 = vmatpush3.bf16.msra.mxu0 %v210_v7  ;;  %80 = vperm.xlu1 %876, %v50_v5   ;;  %v55_v18 = vld [vmem:[%s1243_s2 + $0x40] sm:$0xff]  ;;  %v58_v19 = vld [vmem:[%s1243_s2 + $0x58] sm:$0xff]  ;;  %v57_v20 = vld [vmem:[%s1243_s2 + $0x50] sm:$0xff] }
   0x7   :  { %70 = vperm.xlu0 %875, %v48_v8   ;;  %v882_v21 = vld [vmem:[%s1242_s1 + $0x28] sm:$0xff]   ;;  %v883_v22 = vld [vmem:[%s1242_s1 + $0x30] sm:$0xff]   ;;  %v59_v24 = vld [vmem:[%s1243_s2 + $0x60] sm:$0xff] }
   0x8   :  { %v60_v23 = vld [vmem:[%s1243_s2 + $0x68] sm:$0xff]  ;;  %v62_v25 = vld [vmem:[%s1243_s2 + $0x78] sm:$0xff]  ;;  %v61_v26 = vld [vmem:[%s1243_s2 + $0x70] sm:$0xff] }
   0x9   :  { %809 = vmatmul.mubr.msk.bf16.vlgmr.msra.gmra.mrb[0].mxu0 %vm183_vm1, %v878_v9  ;;  %v884_v27 = vld [vmem:[%s1242_s1 + $0x38] sm:$0xff]  }
   0xa   :  { %812 = vmatprep.mubr.msk.bf16.mxu0 %vm183_vm1, %v879_v10  ;;  %90 = vperm.xlu1 %876, %v52_v11  }
   0xb   :  { %85 = vperm.xlu0 %875, %v51_v12  }
   0xe   :  { %100 = vperm.xlu1 %876, %v54_v13  }
   0xf   :  { %95 = vperm.xlu0 %875, %v53_v14  }
  0x11   :  { %813 = vmatmul.mubr.msk.bf16.gmra.mrb[4].mxu0 %vm183_vm1, %v880_v15 }
  0x12   :  { %816 = vmatprep.mubr.msk.bf16.mxu0 %vm183_vm1, %v881_v16  ;;  %110 = vperm.xlu1 %876, %v56_v17  }
  0x13   :  { %105 = vperm.xlu0 %875, %v55_v18  }
  0x16   :  { %120 = vperm.xlu1 %876, %v58_v19  }
  0x17   :  { %115 = vperm.xlu0 %875, %v57_v20  }
  0x19   :  { %817 = vmatmul.mubr.msk.bf16.gmra.mrb[8].mxu0 %vm183_vm1, %v882_v21 }
  0x1a   :  { %820 = vmatprep.mubr.msk.bf16.mxu0 %vm183_vm1, %v883_v22  ;;  %130 = vperm.xlu1 %876, %v60_v23  }
  0x1b   :  { %125 = vperm.xlu0 %875, %v59_v24  }
  0x1c   :  { %13 = vsyncpa [#allocation4], 0  ;;  %v350_v28 = vld [vmem:[%s1245_s4 + $0x8] sm:$0xff]  ;;  %v349_v29 = vld [vmem:[%s1245_s4] sm:$0xff]  ;;  %s982_s27 = smov [#allocation3]  }
  0x1d   :  { %v352_v30 = vld [vmem:[%s1245_s4 + $0x18] sm:$0xff]  ;;  %v351_v31 = vld [vmem:[%s1245_s4 + $0x10] sm:$0xff]  ;;  %v354_v32 = vld [vmem:[%s1245_s4 + $0x28] sm:$0xff]  ;;  %s749_s28 = sshll.u32 %s982_s27, 4  ;;  %s750_s28 = int_to_ptr.vmem [resolvable:$true] %s749_s28 }
  0x1e   :  { %140 = vperm.xlu1 %876, %v62_v25   ;;  %v353_v33 = vld [vmem:[%s1245_s4 + $0x20] sm:$0xff]  ;;  %v356_v34 = vld [vmem:[%s1245_s4 + $0x38] sm:$0xff]  ;;  %v355_v35 = vld [vmem:[%s1245_s4 + $0x30] sm:$0xff]  ;;  %s957_s29 = scalar_lea.vmem %s750_s28, 16  ;;  %s961_s2 = scalar_lea.vmem %s750_s28, 32 }
  0x1f   :  { %135 = vperm.xlu0 %875, %v61_v26   ;;  %v607_v36 = vld [vmem:[%s1246_s5 + $0x8] sm:$0xff]  ;;  %v606_v37 = vld [vmem:[%s1246_s5] sm:$0xff]  ;;  %v608_v38 = vld [vmem:[%s1246_s5 + $0x10] sm:$0xff]  ;;  %p958_p0 = scmp.ne.s32.totalorder %s750_s28, %s957_s29  ;;  %p962_p1 = scmp.lt.s32.totalorder %s750_s28, %s750_s28 }
  0x20   :  { %v357_v39 = vld [vmem:[%s1245_s4 + $0x40] sm:$0xff]  ;;  %v609_v40 = vld [vmem:[%s1246_s5 + $0x18] sm:$0xff]  ;;  %v358_v41 = vld [vmem:[%s1245_s4 + $0x48] sm:$0xff]  ;;  %p963_p2 = scmp.lt.s32.totalorder %s961_s2, %s957_s29 }
  0x21   :  { %821 = vmatmul.mubr.msk.bf16.gmra.mrb[12].mxu0 %vm183_vm1, %v884_v27  ;;  %v610_v42 = vld [vmem:[%s1246_s5 + $0x20] sm:$0xff]  ;;  %v359_v43 = vld [vmem:[%s1245_s4 + $0x50] sm:$0xff]  ;;  %v611_v44 = vld [vmem:[%s1246_s5 + $0x28] sm:$0xff] }
  0x22   :  { %372 = vperm.xlu1 %876, %v350_v28   ;;  %v360_v45 = vld [vmem:[%s1245_s4 + $0x58] sm:$0xff]  ;;  %v612_v46 = vld [vmem:[%s1246_s5 + $0x30] sm:$0xff]  ;;  %v361_v47 = vld [vmem:[%s1245_s4 + $0x60] sm:$0xff]  ;;  %p964_p3 = por %p963_p2, %p962_p1 }
  0x23   :  { %367 = vperm.xlu0 %875, %v349_v29   ;;  %v613_v48 = vld [vmem:[%s1246_s5 + $0x38] sm:$0xff]  ;;  %v362_v49 = vld [vmem:[%s1245_s4 + $0x68] sm:$0xff]  ;;  %v614_v50 = vld [vmem:[%s1246_s5 + $0x40] sm:$0xff] }
  0x24   :  { %v363_v51 = vld [vmem:[%s1245_s4 + $0x70] sm:$0xff]  ;;  %v615_v52 = vld [vmem:[%s1246_s5 + $0x48] sm:$0xff]  ;;  %v364_v53 = vld [vmem:[%s1245_s4 + $0x78] sm:$0xff]  ;;  %p965_p4 = pnand %p964_p3, %p958_p0 }
  0x25   :  { %v617_v54 = vld [vmem:[%s1246_s5 + $0x58] sm:$0xff]  ;;  %v616_v55 = vld [vmem:[%s1246_s5 + $0x50] sm:$0xff]  ;;  %v619_v56 = vld [vmem:[%s1246_s5 + $0x68] sm:$0xff] }
  0x26   :  { %382 = vperm.xlu1 %876, %v352_v30   ;;  %v618_v57 = vld [vmem:[%s1246_s5 + $0x60] sm:$0xff]  ;;  %v621_v58 = vld [vmem:[%s1246_s5 + $0x78] sm:$0xff]  ;;  %v620_v59 = vld [vmem:[%s1246_s5 + $0x70] sm:$0xff] }
  0x27   :  { %377 = vperm.xlu0 %875, %v351_v31   ;;  %v885_v60 = vld [vmem:[%s1244_s3] sm:$0xff]   ;;  %v886_v61 = vld [vmem:[%s1244_s3 + $0x10] sm:$0xff]  }
  0x28   :  { %840 = vmatprep.mubr.bf16.mxu0 %v885_v60  ;;  %844 = vmatprep.mubr.bf16.mxu1 %v886_v61 }
  0x2a   :  { %392 = vperm.xlu1 %876, %v354_v32  }
  0x2b   :  { %387 = vperm.xlu0 %875, %v353_v33  }
  0x2e   :  { %402 = vperm.xlu1 %876, %v356_v34  }
  0x2f   :  { %397 = vperm.xlu0 %875, %v355_v35  }
  0x32   :  { %629 = vperm.xlu1 %876, %v607_v36  }
  0x33   :  { %624 = vperm.xlu0 %875, %v606_v37  }
  0x36   :  { %634 = vperm.xlu1 %876, %v608_v38  }
  0x37   :  { %407 = vperm.xlu0 %875, %v357_v39  }
  0x3a   :  { %639 = vperm.xlu1 %876, %v609_v40  }
  0x3b   :  { %412 = vperm.xlu0 %875, %v358_v41  }
  0x3e   :  { %644 = vperm.xlu1 %876, %v610_v42  }
  0x3f   :  { %417 = vperm.xlu0 %875, %v359_v43  }
  0x42   :  { %649 = vperm.xlu1 %876, %v611_v44  }
  0x43   :  { %422 = vperm.xlu0 %875, %v360_v45  }
  0x46   :  { %654 = vperm.xlu1 %876, %v612_v46  }
  0x47   :  { %427 = vperm.xlu0 %875, %v361_v47  }
  0x4a   :  { %659 = vperm.xlu1 %876, %v613_v48  }
  0x4b   :  { %432 = vperm.xlu0 %875, %v362_v49  }
  0x4e   :  { %664 = vperm.xlu1 %876, %v614_v50  }
  0x4f   :  { %437 = vperm.xlu0 %875, %v363_v51  }
  0x52   :  { %669 = vperm.xlu1 %876, %v615_v52  }
  0x53   :  { %442 = vperm.xlu0 %875, %v364_v53  }
  0x56   :  { %679 = vperm.xlu1 %876, %v617_v54  }
  0x57   :  { %674 = vperm.xlu0 %875, %v616_v55  }
  0x5a   :  { %689 = vperm.xlu1 %876, %v619_v56  }
  0x5b   :  { %684 = vperm.xlu0 %875, %v618_v57  }
  0x5e   :  { %699 = vperm.xlu1 %876, %v621_v58  }
  0x5f   :  { %694 = vperm.xlu0 %875, %v620_v59  }
  0x81   :  { %v66_v62 = vpop.permute.xlu0 %65  ;;  %v76_v63 = vpop.permute.xlu1 %75 }
  0x85   :  { %v81_v1 = vpop.permute.xlu1 %80 }
  0x86   :  { %v71_v0 = vpop.permute.xlu0 %70 }
  0x89   :  { %v91_v3 = vpop.permute.xlu1 %90 }
  0x8a   :  { %v86_v2 = vpop.permute.xlu0 %85 }
  0x8d   :  { %v101_v8 = vpop.permute.xlu1 %100 }
  0x8e   :  { %v96_v4 = vpop.permute.xlu0 %95 }
  0x91   :  { %v111_v15 = vpop.permute.xlu1 %110 }
  0x92   :  { %v106_v14 = vpop.permute.xlu0 %105 }
  0x95   :  { %v121_v26 = vpop.permute.xlu1 %120 }
  0x96   :  { %v116_v23 = vpop.permute.xlu0 %115 }
  0x99   :  { %v131_v40 = vpop.permute.xlu1 %130 }
  0x9a   :  { %v126_v34 = vpop.permute.xlu0 %125 }
  0x9d   :  { %v141_v52 = vpop.permute.xlu1 %140 }
  0x9e   :  { %v136_v46 = vpop.permute.xlu0 %135 }
  0xdc   :  { %v810_v5 = vpop.f32.mrb[0].mxu0 }
  0xdd   :  { %v255_v6 = vadd.f32 %v810_v5, %v76_v63  ;;  %v246_v7 = vpop.f32.mrb[1].mxu0 }
  0xde   :  { %v247_v9 = vadd.f32 %v246_v7, %v66_v62  ;;  %v811_v10 = vpop.f32.mrb[2].mxu0  ;;  %v888_v7 = vld [vmem:[%s1244_s3 + $0x18] sm:$0xff]  }
  0xdf   :  { %v258_v11 = vadd.f32 %v811_v10, %v81_v1  ;;  %893 = vtanh.f32 %v255_v6  ;;  %v249_v12 = vpop.f32.mrb[3].mxu0  ;;  %v887_v6 = vld [vmem:[%s1244_s3 + $0x8] sm:$0xff]   ;;  %v891_v10 = vld [vmem:[%s1244_s3 + $0x30] sm:$0xff]  }
  0xe0   :  { %v250_v13 = vadd.f32 %v249_v12, %v71_v0  ;;  %v368_v12 = vpop.permute.xlu0 %367 }
  0xe1   :  { %895 = vtanh.f32 %v258_v11  ;;  %v892_v11 = vld [vmem:[%s1244_s3 + $0x38] sm:$0xff]  }
  0xe2   :  { %897 = vtanh.f32 %v247_v9  ;;  %v890_v9 = vld [vmem:[%s1244_s3 + $0x28] sm:$0xff]  }
  0xe3   :  { %899 = vtanh.f32 %v250_v13  ;;  %v373_v13 = vpop.permute.xlu1 %372 }
  0xe4   :  { %v814_v16 = vpop.f32.mrb[4].mxu0 }
  0xe5   :  { %v271_v17 = vadd.f32 %v814_v16, %v96_v4  ;;  %v262_v18 = vpop.f32.mrb[5].mxu0 }
  0xe6   :  { %v263_v19 = vadd.f32 %v262_v18, %v86_v2  ;;  %v815_v20 = vpop.f32.mrb[6].mxu0 }
  0xe7   :  { %901 = vtanh.f32 %v271_v17  ;;  %v274_v21 = vadd.f32 %v815_v20, %v101_v8  ;;  %v265_v22 = vpop.f32.mrb[7].mxu0  ;;  %v889_v8 = vld [vmem:[%s1244_s3 + $0x20] sm:$0xff]  }
  0xe8   :  { %903 = vtanh.f32 %v263_v19  ;;  %v266_v24 = vadd.f32 %v265_v22, %v91_v3 }
  0xe9   :  { %905 = vtanh.f32 %v274_v21  ;;  %v894_v25 = vpop.eup %893 }
  0xea   :  { %907 = vtanh.f32 %v266_v24 }
  0xeb   :  { %v896_v27 = vpop.eup %895 }
  0xec   :  { %v898_v28 = vpop.eup %897  ;;  %v818_v29 = vpop.f32.mrb[8].mxu0  ;;  %v342_v30 = vpack.c.bf16 %v896_v27, %v894_v25 }
  0xed   :  { %v900_v31 = vpop.eup %899  ;;  %v287_v32 = vadd.f32 %v818_v29, %v116_v23  ;;  %v278_v33 = vpop.f32.mrb[9].mxu0 }
  0xee   :  { %v279_v35 = vadd.f32 %v278_v33, %v106_v14  ;;  %v819_v36 = vpop.f32.mrb[10].mxu0  ;;  %v341_v37 = vpack.c.bf16 %v900_v31, %v898_v28  ;;  %v378_v14 = vpop.permute.xlu0 %377 }
  0xef   :  { %909 = vtanh.f32 %v287_v32  ;;  %v290_v38 = vadd.f32 %v819_v36, %v121_v26  ;;  %v281_v39 = vpop.f32.mrb[11].mxu0 }
  0xf0   :  { %911 = vtanh.f32 %v279_v35  ;;  %v282_v41 = vadd.f32 %v281_v39, %v111_v15  ;;  %824 = vmatprep.subr.bf16.mxu0 %v341_v37  ;;  %856 = vmatprep.subr.bf16.mxu1 %v341_v37  ;;  %v383_v15 = vpop.permute.xlu1 %382 }
  0xf1   :  { %v902_v42 = vpop.eup %901  ;;  %913 = vtanh.f32 %v290_v38  ;;  %825 = vmatpush3.bf16.msra.mxu0 %v341_v37  ;;  %864 = vmatpush3.bf16.msra.mxu1 %v341_v37 }
  0xf2   :  { %v904_v43 = vpop.eup %903  ;;  %915 = vtanh.f32 %v282_v41  ;;  %826 = vmatprep.subr.bf16.mxu0 %v342_v30  ;;  %857 = vmatprep.subr.bf16.mxu1 %v342_v30  ;;  %v388_v16 = vpop.permute.xlu0 %387 }
  0xf3   :  { %v906_v44 = vpop.eup %905 }
  0xf4   :  { %v908_v45 = vpop.eup %907  ;;  %v822_v47 = vpop.f32.mrb[12].mxu0  ;;  %v344_v48 = vpack.c.bf16 %v906_v44, %v902_v42 }
  0xf5   :  { %v303_v49 = vadd.f32 %v822_v47, %v136_v46  ;;  %827 = vmatpush3.bf16.msra.mxu0 %v342_v30  ;;  %865 = vmatpush3.bf16.msra.mxu1 %v342_v30  ;;  %v294_v50 = vpop.f32.mrb[13].mxu0  ;;  %v343_v51 = vpack.c.bf16 %v908_v45, %v904_v43  ;;  %v393_v17 = vpop.permute.xlu1 %392 }
  0xf6   :  { %v295_v53 = vadd.f32 %v294_v50, %v126_v34  ;;  %v823_v54 = vpop.f32.mrb[14].mxu0  ;;  %v398_v18 = vpop.permute.xlu0 %397 }
  0xf7   :  { %917 = vtanh.f32 %v303_v49  ;;  %v306_v55 = vadd.f32 %v823_v54, %v141_v52  ;;  %v297_v56 = vpop.f32.mrb[15].mxu0  ;;  %828 = vmatprep.subr.bf16.mxu0 %v343_v51  ;;  %858 = vmatprep.subr.bf16.mxu1 %v343_v51 }
  0xf8   :  { %919 = vtanh.f32 %v295_v53  ;;  %v298_v57 = vadd.f32 %v297_v56, %v131_v40 }
  0xf9   :  { %v910_v58 = vpop.eup %909  ;;  %921 = vtanh.f32 %v306_v55  ;;  %829 = vmatpush3.bf16.msra.mxu0 %v343_v51  ;;  %866 = vmatpush3.bf16.msra.mxu1 %v343_v51  ;;  %v403_v19 = vpop.permute.xlu1 %402 }
  0xfa   :  { %v912_v59 = vpop.eup %911  ;;  %923 = vtanh.f32 %v298_v57  ;;  %830 = vmatprep.subr.bf16.mxu0 %v344_v48  ;;  %859 = vmatprep.subr.bf16.mxu1 %v344_v48  ;;  %v625_v20 = vpop.permute.xlu0 %624 }
  0xfb   :  { %v914_v60 = vpop.eup %913 }
  0xfc   :  { %v916_v61 = vpop.eup %915  ;;  %v346_v62 = vpack.c.bf16 %v914_v60, %v910_v58 }
  0xfd   :  { %831 = vmatpush3.bf16.msra.mxu0 %v344_v48  ;;  %867 = vmatpush3.bf16.msra.mxu1 %v344_v48  ;;  %v345_v63 = vpack.c.bf16 %v916_v61, %v912_v59  ;;  %v630_v21 = vpop.permute.xlu1 %629 }
  0xfe   :  { %v408_v22 = vpop.permute.xlu0 %407 }
  0xff   :  { %832 = vmatprep.subr.bf16.mxu0 %v345_v63  ;;  %860 = vmatprep.subr.bf16.mxu1 %v345_v63 }
 0x101   :  { %v918_v0 = vpop.eup %917  ;;  %833 = vmatpush3.bf16.msra.mxu0 %v345_v63  ;;  %868 = vmatpush3.bf16.msra.mxu1 %v345_v63  ;;  %v635_v23 = vpop.permute.xlu1 %634 }
 0x102   :  { %v920_v1 = vpop.eup %919  ;;  %834 = vmatprep.subr.bf16.mxu0 %v346_v62  ;;  %861 = vmatprep.subr.bf16.mxu1 %v346_v62  ;;  %v413_v24 = vpop.permute.xlu0 %412 }
 0x103   :  { %v922_v2 = vpop.eup %921 }
 0x104   :  { %v924_v3 = vpop.eup %923  ;;  %v348_v4 = vpack.c.bf16 %v922_v2, %v918_v0 }
 0x105   :  { %835 = vmatpush3.bf16.msra.mxu0 %v346_v62  ;;  %869 = vmatpush3.bf16.msra.mxu1 %v346_v62  ;;  %v347_v5 = vpack.c.bf16 %v924_v3, %v920_v1  ;;  %v640_v25 = vpop.permute.xlu1 %639 }
 0x106   :  { %v418_v26 = vpop.permute.xlu0 %417 }
 0x107   :  { %836 = vmatprep.subr.bf16.mxu0 %v347_v5  ;;  %862 = vmatprep.subr.bf16.mxu1 %v347_v5 }
 0x109   :  { %837 = vmatpush3.bf16.msra.mxu0 %v347_v5  ;;  %870 = vmatpush3.bf16.msra.mxu1 %v347_v5  ;;  %v645_v27 = vpop.permute.xlu1 %644 }
 0x10a   :  { %838 = vmatprep.subr.bf16.mxu0 %v348_v4  ;;  %863 = vmatprep.subr.bf16.mxu1 %v348_v4  ;;  %v423_v28 = vpop.permute.xlu0 %422 }
 0x10d   :  { %839 = vmatpush3.bf16.msra.mxu0 %v348_v4  ;;  %871 = vmatpush3.bf16.msra.mxu1 %v348_v4  ;;  %v650_v39 = vpop.permute.xlu1 %649 }
 0x10e   :  { %v428_v43 = vpop.permute.xlu0 %427 }
 0x110   :  { %841 = vmatmul.mubr.bf16.vlgmr.msra.gmra.mrb[16].mxu0 %v887_v6  ;;  %845 = vmatmul.mubr.bf16.vlgmr.msra.gmra.mrb[0].mxu1 %v888_v7 }
 0x111   :  { %848 = vmatprep.mubr.bf16.mxu1 %v889_v8  ;;  %v655_v47 = vpop.permute.xlu1 %654 }
 0x112   :  { %v433_v51 = vpop.permute.xlu0 %432 }
 0x115   :  { %v660_v55 = vpop.permute.xlu1 %659 }
 0x116   :  { %v438_v2 = vpop.permute.xlu0 %437 }
 0x118   :  { %849 = vmatmul.mubr.bf16.gmra.mrb[4].mxu1 %v890_v9 }
 0x119   :  { %852 = vmatprep.mubr.bf16.mxu1 %v891_v10  ;;  %v665_v7 = vpop.permute.xlu1 %664 }
 0x120   :  { %853 = vmatmul.mubr.bf16.gmra.mrb[8].mxu1 %v892_v11 }
 0x1e3   :  { %v842_v29 = vpop.f32.mrb[16].mxu0  ;;  %v846_v30 = vpop.f32.mrb[0].mxu1 }
 0x1e4   :  { %v527_v31 = vpop.f32.mrb[17].mxu0  ;;  %v543_v32 = vpop.f32.mrb[1].mxu1  ;;  %v536_v38 = vadd.f32 %v842_v29, %v378_v14  ;;  %v552_v50 = vadd.f32 %v846_v30, %v398_v18 }
 0x1e5   :  { %v843_v33 = vpop.f32.mrb[18].mxu0  ;;  %v847_v34 = vpop.f32.mrb[2].mxu1  ;;  %v528_v35 = vadd.f32 %v527_v31, %v368_v12  ;;  %v544_v44 = vadd.f32 %v543_v32, %v388_v16 }
 0x1e6   :  { %v530_v36 = vpop.f32.mrb[19].mxu0  ;;  %v546_v37 = vpop.f32.mrb[3].mxu1  ;;  %v539_v41 = vadd.f32 %v843_v33, %v383_v15  ;;  %v555_v52 = vadd.f32 %v847_v34, %v403_v19 }
 0x1e7   :  { %v531_v40 = vadd.f32 %v530_v36, %v373_v13  ;;  %925 = vtanh.f32 %v528_v35  ;;  %v547_v48 = vadd.f32 %v546_v37, %v393_v17  ;;  %v443_v16 = vpop.permute.xlu0 %442 }
 0x1e8   :  { %927 = vtanh.f32 %v536_v38 }
 0x1e9   :  { %929 = vtanh.f32 %v531_v40 }
 0x1ea   :  { %931 = vtanh.f32 %v539_v41 }
 0x1eb   :  { %v850_v42 = vpop.f32.mrb[4].mxu1  ;;  %933 = vtanh.f32 %v544_v44 }
 0x1ec   :  { %v559_v45 = vpop.f32.mrb[5].mxu1  ;;  %935 = vtanh.f32 %v547_v48  ;;  %v568_v3 = vadd.f32 %v850_v42, %v418_v26 }
 0x1ed   :  { %v851_v46 = vpop.f32.mrb[6].mxu1  ;;  %937 = vtanh.f32 %v552_v50  ;;  %v560_v56 = vadd.f32 %v559_v45, %v408_v22 }
 0x1ee   :  { %v562_v49 = vpop.f32.mrb[7].mxu1  ;;  %939 = vtanh.f32 %v555_v52  ;;  %v571_v8 = vadd.f32 %v851_v46, %v423_v28 }
 0x1ef   :  { %v563_v61 = vadd.f32 %v562_v49, %v413_v24  ;;  %941 = vtanh.f32 %v560_v56 }
 0x1f1   :  { %v926_v54 = vpop.eup %925  ;;  %943 = vtanh.f32 %v563_v61 }
 0x1f2   :  { %v928_v58 = vpop.eup %927  ;;  %v702_v63 = vmul.f32 %v926_v54, %v625_v20  ;;  %945 = vtanh.f32 %v568_v3 }
 0x1f3   :  { %v854_v53 = vpop.f32.mrb[8].mxu1  ;;  %v930_v60 = vpop.eup %929  ;;  %v704_v4 = vmul.f32 %v928_v58, %v635_v23  ;;  %947 = vtanh.f32 %v571_v8 }
 0x1f4   :  { %v575_v57 = vpop.f32.mrb[9].mxu1  ;;  %v703_v0 = vmul.f32 %v930_v60, %v630_v21  ;;  %v932_v1 = vpop.eup %931  ;;  %v584_v22 = vadd.f32 %v854_v53, %v438_v2 }
 0x1f5   :  { %v855_v59 = vpop.f32.mrb[10].mxu1  ;;  %v934_v6 = vpop.eup %933  ;;  %v705_v9 = vmul.f32 %v932_v1, %v640_v25  ;;  %v576_v12 = vadd.f32 %v575_v57, %v428_v43 }
 0x1f6   :  { %v578_v62 = vpop.f32.mrb[11].mxu1  ;;  %v718_v5 = vadd.f32 %v703_v0, %v702_v63  ;;  %v936_v11 = vpop.eup %935  ;;  %v706_v13 = vmul.f32 %v934_v6, %v645_v27  ;;  %v587_v25 = vadd.f32 %v855_v59, %v443_v16  ;;  %v740_v0 = vstv %s1247_s6 }
 0x1f7   :  { %v938_v15 = vpop.eup %937  ;;  %v579_v17 = vadd.f32 %v578_v62, %v433_v51  ;;  %v707_v18 = vmul.f32 %v936_v11, %v650_v39  ;;  %v670_v21 = vpop.permute.xlu1 %669  ;;  %949 = vtanh.f32 %v576_v12 }
 0x1f8   :  { %v719_v10 = vadd.f32 %v718_v5, %v704_v4  ;;  %v940_v20 = vpop.eup %939  ;;  %v708_v23 = vmul.f32 %v938_v15, %v655_v47  ;;  %v675_v27 = vpop.permute.xlu0 %674 }
 0x1f9   :  { %v942_v26 = vpop.eup %941  ;;  %951 = vtanh.f32 %v579_v17  ;;  %v709_v28 = vmul.f32 %v940_v20, %v660_v55 }
 0x1fa   :  { %v720_v14 = vadd.f32 %v719_v10, %v705_v9  ;;  %953 = vtanh.f32 %v584_v22  ;;  %v710_v31 = vmul.f32 %v942_v26, %v665_v7 }
 0x1fb   :  { %v944_v30 = vpop.eup %943  ;;  %v680_v34 = vpop.permute.xlu1 %679  ;;  %955 = vtanh.f32 %v587_v25 }
 0x1fc   :  { %v721_v19 = vadd.f32 %v720_v14, %v706_v13  ;;  %v946_v33 = vpop.eup %945  ;;  %v711_v36 = vmul.f32 %v944_v30, %v670_v21  ;;  %v685_v41 = vpop.permute.xlu0 %684 }
 0x1fd   :  { %v948_v37 = vpop.eup %947  ;;  %v712_v38 = vmul.f32 %v946_v33, %v675_v27 }
 0x1fe   :  { %v722_v24 = vadd.f32 %v721_v19, %v707_v18  ;;  %v713_v42 = vmul.f32 %v948_v37, %v680_v34 }
 0x1ff   :  { %v690_v45 = vpop.permute.xlu1 %689 }
 0x200   :  { %v723_v29 = vadd.f32 %v722_v24, %v708_v23  ;;  %v695_v52 = vpop.permute.xlu0 %694 }
 0x201   :  { %v950_v40 = vpop.eup %949 }
 0x202   :  { %v724_v32 = vadd.f32 %v723_v29, %v709_v28  ;;  %v714_v46 = vmul.f32 %v950_v40, %v685_v41 }
 0x203   :  { %v952_v44 = vpop.eup %951  ;;  %v700_v55 = vpop.permute.xlu1 %699 }
 0x204   :  { %v725_v35 = vadd.f32 %v724_v32, %v710_v31  ;;  %v954_v48 = vpop.eup %953  ;;  %v715_v50 = vmul.f32 %v952_v44, %v690_v45 }
 0x205   :  { %v956_v51 = vpop.eup %955  ;;  %v716_v53 = vmul.f32 %v954_v48, %v695_v52 }
 0x206   :  { %v726_v39 = vadd.f32 %v725_v35, %v711_v36  ;;  %v717_v56 = vmul.f32 %v956_v51, %v700_v55 }
 0x208   :  { %v727_v43 = vadd.f32 %v726_v39, %v712_v38 }
 0x20a   :  { %v728_v47 = vadd.f32 %v727_v43, %v713_v42 }
 0x20c   :  { %v729_v49 = vadd.f32 %v728_v47, %v714_v46 }
 0x20e   :  { %v730_v54 = vadd.f32 %v729_v49, %v715_v50 }
 0x210   :  { %v731_v57 = vadd.f32 %v730_v54, %v716_v53 }
 0x212   :  { %v732_v58 = vadd.f32 %v731_v57, %v717_v56 }
 0x214   :  { %v733_v59 = vrot.slane %v732_v58, 4 }
 0x216   :  { %v734_v60 = vadd.f32 %v733_v59, %v732_v58 }
 0x218   :  { %v735_v61 = vrot.slane %v734_v60, 2 }
 0x21a   :  { %v736_v62 = vadd.f32 %v735_v61, %v734_v60 }
 0x21c   :  { %v737_v63 = vrot.slane %v736_v62, 1 }
 0x21e   :  { %v738_v1 = vadd.f32 %v737_v63, %v736_v62 }
 0x220   :  { %v741_v2 = vadd.f32 %v740_v0, %v738_v1 }
 0x222   :  { %742 = vst [vmem:[#allocation3] sm:$0x1] %v741_v2 }
 0x223   :  { %968 = shalt.err (!%p965_p4)
}
 0x224   :  { %s969_s8 = scalar_lea.hbm %s1248_s7, 16 }
 0x225   :  { %p970_p5 = scmp.ne.s32.totalorder %s1248_s7, %s969_s8  ;;  %p973_p6 = scmp.lt.u32.totalorder %s969_s8, %s1248_s7 }
 0x227   :  { %p975_p7 = pnand %p973_p6, %p970_p5 }
 0x229   :  { %978 = shalt.err (!%p975_p7)
}
 0x22a   :  { %752 = dma.vmem_to_hbm [thread:$0]  %s750_s28, 16, %s1248_s7, [#allocation4]  }
 0x22b   :  { %979 = dma.done.wait [#allocation4], 16  }
 0x22c   :  { %980 = vsyncadd [#allocation4], 4294967280 }
 0x22d   :  { %756 = vsyncpa [#allocation4], 1 }

</bundles_post_ra>
